<compile_context>
chip_gen: v7x
topology: tpu7x:2x2x1
jax: 0.10.0
libtpu: 0.0.40
codegen_flags: <defaults>
</compile_context>

<pallas_src>
import functools

import jax
import jax.numpy as jnp
from jax.experimental import pallas as pl
from jax.experimental.pallas import tpu as pltpu


def _leaky_relu(x, slope=0.1):
    # max(x, slope*x) == leaky_relu for 0 < slope < 1 (mul + max on the VPU).
    return jnp.maximum(x, slope * x)


def mlp_kernel(x_ref, w1t_ref, b1_ref, w2t_ref, b2_ref, w3t_ref, b3_ref, o_ref):
    c_in = x_ref.shape[0]

    x_t = x_ref[...]                                  # (c_in, tile) f32, lane-dense

    # ---- layer 1: (H, c_in) x (c_in, tile); c_in = 4 -> VPU outer-product FMAs
    h = b1_ref[...] + w1t_ref[:, 0:1] * x_t[0:1, :]   # (H,1) + (H,1)*(1,tile) -> (H,tile)
    for k in range(1, c_in):                          # static unroll (c_in = 4)
        h = h + w1t_ref[:, k:k + 1] * x_t[k:k + 1, :]
    h = _leaky_relu(h)

    # ---- layer 2: (H, H) x (H, tile) -> MXU ---------------------------------
    h = jnp.dot(w2t_ref[...], h, preferred_element_type=jnp.float32) + b2_ref[...]
    h = _leaky_relu(h)

    # ---- layer 3: (C_out, H) x (H, tile) -> MXU; lane-dense (C_out, tile) out
    out = jnp.dot(w3t_ref[...], h, preferred_element_type=jnp.float32) + b3_ref[...]
    o_ref[...] = out.astype(o_ref.dtype)              # single dense store per tile


def _vmem_limit_bytes(tile, c_in, hid, c_out):
    """VMEM budget with (8,128) sublane/lane padding accounted for."""
    f32 = 4

    def padded(rows, cols):
        return ((rows + 7) // 8 * 8) * ((cols + 127) // 128 * 128) * f32

    io = 2 * (padded(c_in, tile) + padded(c_out, tile))          # double-buffered x^T / out^T
    weights = 2 * (padded(hid, c_in) + padded(hid, hid) + padded(c_out, hid)
                   + 2 * padded(hid, 1) + padded(c_out, 1))
    acts = 4 * padded(hid, tile)                                 # live (H, tile) intermediates
    need = io + weights + acts
    # clamp: never below v5e's 16 MiB scoped default, never above a v7x-safe 48 MiB
    return int(min(max(2 * need, 16 * 1024 * 1024), 48 * 1024 * 1024))


def mlp_forward(x, params, clip_num=5, row_tile=8192):
    """Pallas forward pass.

    `clip_num` is accepted for parity with the PyTorch module, but since all
    chunks share the same weights the chunk/concat is a no-op, so rows are
    simply tiled as coarsely as possible (any N is supported).
    """
    del clip_num  # chunking is a mathematical no-op for shared weights
    assert row_tile % 128 == 0 and row_tile > 0
    w1, b1, w2, b2, w3, b3 = params
    n, c_in = x.shape
    hid = w1.shape[1]
    c_out = w3.shape[1]

    # Feature-major layout: rows on the lane axis.  Tiny wrapper-side
    # transposes ((4, N) arrays) are negligible vs. in-kernel lane density.
    x_t = x.T                      # (c_in, n)
    w1t = w1.T                     # (hid, c_in)
    w2t = w2.T                     # (hid, hid)
    w3t = w3.T                     # (c_out, hid)
    b1c = b1.reshape(hid, 1)
    b2c = b2.reshape(hid, 1)
    b3c = b3.reshape(c_out, 1)

    # Lane tiling: single full-extent block for small n; otherwise at least 2
    # blocks (keeps both v7x TensorCores busy) with lane dim a multiple of 128,
    # capped at row_tile (big tiles amortize the ~0.35 us per-step overhead).
    if n <= 256:
        tile = n
    else:
        two_way = (((n + 1) // 2) + 127) // 128 * 128
        tile = min(row_tile, max(128, two_way))
    grid = (pl.cdiv(n, tile),)     # ragged last block handled by Pallas masking

    const = lambda shape: pl.BlockSpec(shape, lambda i: (0, 0))

    out_t = pl.pallas_call(
        mlp_kernel,
        out_shape=jax.ShapeDtypeStruct((c_out, n), x.dtype),
        grid=grid,
        in_specs=[
            pl.BlockSpec((c_in, tile), lambda i: (0, i)),   # x^T lane tile
            const((hid, c_in)),     # w1^T
            const((hid, 1)),        # b1
            const((hid, hid)),      # w2^T
            const((hid, 1)),        # b2
            const((c_out, hid)),    # w3^T
            const((c_out, 1)),      # b3
        ],
        out_specs=pl.BlockSpec((c_out, tile), lambda i: (0, i)),
        compiler_params=pltpu.CompilerParams(
            dimension_semantics=("parallel",),
            vmem_limit_bytes=_vmem_limit_bytes(tile, c_in, hid, c_out),
        ),
    )(x_t, w1t, b1c, w2t, b2c, w3t, b3c)

    return out_t.T                 # back to (n, c_out)


def init_params(key, c_in, hidden, c_out):
    """Deterministic parameter init (weights stored (in, out), as x @ w)."""
    k1, k2, k3, k4, k5, k6 = jax.random.split(key, 6)
    w1 = jax.random.normal(k1, (c_in, hidden), jnp.float32) * 0.1
    b1 = jax.random.normal(k2, (hidden,), jnp.float32) * 0.1
    w2 = jax.random.normal(k3, (hidden, hidden), jnp.float32) * 0.1
    b2 = jax.random.normal(k4, (hidden,), jnp.float32) * 0.1
    w3 = jax.random.normal(k5, (hidden, c_out), jnp.float32) * 0.1
    b3 = jax.random.normal(k6, (c_out,), jnp.float32) * 0.1
    return (w1, b1, w2, b2, w3, b3)


def mlp_reference(x, params):
    w1, b1, w2, b2, w3, b3 = params
    h = _leaky_relu(x @ w1 + b1)
    h = _leaky_relu(h @ w2 + b2)
    return h @ w3 + b3


if __name__ == "__main__":
    key = jax.random.PRNGKey(0)
    kx, kp = jax.random.split(key)

    c_in, hidden, c_out = 4, 32, 4
    params = init_params(kp, c_in, hidden, c_out)

    # Case 1: original demo shape (N=40, clip_num=5) -> single full-extent block.
    n = 40
    x = jax.random.normal(kx, (n, c_in), jnp.float32)
    run = jax.jit(functools.partial(mlp_forward, clip_num=5))
    out = jax.block_until_ready(run(x, params))
    ref = mlp_reference(x, params)
    assert out.shape == (n, c_out)
    assert jnp.allclose(out, ref, atol=1e-5, rtol=1e-5)

    # Case 2: N not divisible by clip_num (torch.chunk's unequal split) works,
    # since chunking with shared weights is a no-op.
    n2 = 34
    x2 = jax.random.normal(jax.random.PRNGKey(1), (n2, c_in), jnp.float32)
    out2 = jax.block_until_ready(run(x2, params))
    assert jnp.allclose(out2, mlp_reference(x2, params), atol=1e-5, rtol=1e-5)

    # Case 3: exercise the multi-block "parallel" grid + ragged edge block
    # (n=300, tile=128 -> 3 grid steps, last block masked).
    n3 = 300
    x3 = jax.random.normal(jax.random.PRNGKey(2), (n3, c_in), jnp.float32)
    run_tiled = jax.jit(functools.partial(mlp_forward, clip_num=5, row_tile=128))
    out3 = jax.block_until_ready(run_tiled(x3, params))
    assert out3.shape == (n3, c_out)
    assert jnp.allclose(out3, mlp_reference(x3, params), atol=1e-5, rtol=1e-5)

    print("KERNEL_OK")
</pallas_src>

<mosaic_0001>
module attributes {stable_mosaic.version = 11 : i64} {
  func.func @mlp_kernel(%arg0: i32, %arg1: memref<4x40xf32, #tpu.memory_space<vmem>>, %arg2: memref<32x4xf32, #tpu.memory_space<vmem>>, %arg3: memref<32x1xf32, #tpu.memory_space<vmem>>, %arg4: memref<32x32xf32, #tpu.memory_space<vmem>>, %arg5: memref<32x1xf32, #tpu.memory_space<vmem>>, %arg6: memref<4x32xf32, #tpu.memory_space<vmem>>, %arg7: memref<4x1xf32, #tpu.memory_space<vmem>>, %arg8: memref<4x40xf32, #tpu.memory_space<vmem>>) attributes {dimension_semantics = [#tpu.dimension_semantics<parallel>], iteration_bounds = array<i64: 1>, scalar_prefetch = 0 : i64, scratch_operands = 0 : i64, tpu.core_type = #tpu.core_type<tc>, window_params = [{transform_indices = @transform_0, window_bounds = array<i64: 4, 40>}, {pipeline_mode = #tpu.pipeline_mode<synchronous>, transform_indices = @transform_1, window_bounds = array<i64: 32, 4>}, {pipeline_mode = #tpu.pipeline_mode<synchronous>, transform_indices = @transform_2, window_bounds = array<i64: 32, 1>}, {pipeline_mode = #tpu.pipeline_mode<synchronous>, transform_indices = @transform_3, window_bounds = array<i64: 32, 32>}, {pipeline_mode = #tpu.pipeline_mode<synchronous>, transform_indices = @transform_4, window_bounds = array<i64: 32, 1>}, {pipeline_mode = #tpu.pipeline_mode<synchronous>, transform_indices = @transform_5, window_bounds = array<i64: 4, 32>}, {pipeline_mode = #tpu.pipeline_mode<synchronous>, transform_indices = @transform_6, window_bounds = array<i64: 4, 1>}, {transform_indices = @transform_7, window_bounds = array<i64: 4, 40>}]} {
    %c0 = arith.constant 0 : index
    %c0_0 = arith.constant 0 : index
    %0 = vector.load %arg1[%c0, %c0_0] : memref<4x40xf32, #tpu.memory_space<vmem>>, vector<4x40xf32>
    %c0_1 = arith.constant 0 : index
    %c0_2 = arith.constant 0 : index
    %1 = vector.load %arg3[%c0_1, %c0_2] : memref<32x1xf32, #tpu.memory_space<vmem>>, vector<32x1xf32>
    %c0_3 = arith.constant 0 : index
    %c0_4 = arith.constant 0 : index
    %2 = vector.load %arg2[%c0_3, %c0_4] : memref<32x4xf32, #tpu.memory_space<vmem>>, vector<32x1xf32>
    %3 = vector.extract_strided_slice %0 {offsets = [0, 0], sizes = [1, 40], strides = [1, 1]} : vector<4x40xf32> to vector<1x40xf32>
    %4 = vector.broadcast %2 : vector<32x1xf32> to vector<32x40xf32>
    %5 = vector.broadcast %3 : vector<1x40xf32> to vector<32x40xf32>
    %6 = arith.mulf %4, %5 : vector<32x40xf32>
    %7 = vector.broadcast %1 : vector<32x1xf32> to vector<32x40xf32>
    %8 = arith.addf %7, %6 : vector<32x40xf32>
    %c0_5 = arith.constant 0 : index
    %c1 = arith.constant 1 : index
    %9 = vector.load %arg2[%c0_5, %c1] : memref<32x4xf32, #tpu.memory_space<vmem>>, vector<32x1xf32>
    %10 = vector.extract_strided_slice %0 {offsets = [1, 0], sizes = [1, 40], strides = [1, 1]} : vector<4x40xf32> to vector<1x40xf32>
    %11 = vector.broadcast %9 : vector<32x1xf32> to vector<32x40xf32>
    %12 = vector.broadcast %10 : vector<1x40xf32> to vector<32x40xf32>
    %13 = arith.mulf %11, %12 : vector<32x40xf32>
    %14 = arith.addf %8, %13 : vector<32x40xf32>
    %c0_6 = arith.constant 0 : index
    %c2 = arith.constant 2 : index
    %15 = vector.load %arg2[%c0_6, %c2] : memref<32x4xf32, #tpu.memory_space<vmem>>, vector<32x1xf32>
    %16 = vector.extract_strided_slice %0 {offsets = [2, 0], sizes = [1, 40], strides = [1, 1]} : vector<4x40xf32> to vector<1x40xf32>
    %17 = vector.broadcast %15 : vector<32x1xf32> to vector<32x40xf32>
    %18 = vector.broadcast %16 : vector<1x40xf32> to vector<32x40xf32>
    %19 = arith.mulf %17, %18 : vector<32x40xf32>
    %20 = arith.addf %14, %19 : vector<32x40xf32>
    %c0_7 = arith.constant 0 : index
    %c3 = arith.constant 3 : index
    %21 = vector.load %arg2[%c0_7, %c3] : memref<32x4xf32, #tpu.memory_space<vmem>>, vector<32x1xf32>
    %22 = vector.extract_strided_slice %0 {offsets = [3, 0], sizes = [1, 40], strides = [1, 1]} : vector<4x40xf32> to vector<1x40xf32>
    %23 = vector.broadcast %21 : vector<32x1xf32> to vector<32x40xf32>
    %24 = vector.broadcast %22 : vector<1x40xf32> to vector<32x40xf32>
    %25 = arith.mulf %23, %24 : vector<32x40xf32>
    %26 = arith.addf %20, %25 : vector<32x40xf32>
    %cst = arith.constant 1.000000e-01 : f32
    %27 = vector.broadcast %cst : f32 to vector<32x40xf32>
    %28 = arith.mulf %27, %26 : vector<32x40xf32>
    %29 = arith.maximumf %26, %28 : vector<32x40xf32>
    %c0_8 = arith.constant 0 : index
    %c0_9 = arith.constant 0 : index
    %30 = vector.load %arg4[%c0_8, %c0_9] : memref<32x32xf32, #tpu.memory_space<vmem>>, vector<32x32xf32>
    %cst_10 = arith.constant dense<0.000000e+00> : vector<32x40xf32>
    %31 = tpu.matmul %30, %29, %cst_10 {dimension_numbers = #tpu.dot_dimension_numbers<[1], [0], [0], [1], [0, 0, 1, 1], [], []>} : vector<32x32xf32>, vector<32x40xf32>, vector<32x40xf32> -> vector<32x40xf32>
    %c0_11 = arith.constant 0 : index
    %c0_12 = arith.constant 0 : index
    %32 = vector.load %arg5[%c0_11, %c0_12] : memref<32x1xf32, #tpu.memory_space<vmem>>, vector<32x1xf32>
    %33 = vector.broadcast %32 : vector<32x1xf32> to vector<32x40xf32>
    %34 = arith.addf %31, %33 : vector<32x40xf32>
    %cst_13 = arith.constant 1.000000e-01 : f32
    %35 = vector.broadcast %cst_13 : f32 to vector<32x40xf32>
    %36 = arith.mulf %35, %34 : vector<32x40xf32>
    %37 = arith.maximumf %34, %36 : vector<32x40xf32>
    %c0_14 = arith.constant 0 : index
    %c0_15 = arith.constant 0 : index
    %38 = vector.load %arg6[%c0_14, %c0_15] : memref<4x32xf32, #tpu.memory_space<vmem>>, vector<4x32xf32>
    %cst_16 = arith.constant dense<0.000000e+00> : vector<4x40xf32>
    %39 = tpu.matmul %38, %37, %cst_16 {dimension_numbers = #tpu.dot_dimension_numbers<[1], [0], [0], [1], [0, 0, 1, 1], [], []>} : vector<4x32xf32>, vector<32x40xf32>, vector<4x40xf32> -> vector<4x40xf32>
    %c0_17 = arith.constant 0 : index
    %c0_18 = arith.constant 0 : index
    %40 = vector.load %arg7[%c0_17, %c0_18] : memref<4x1xf32, #tpu.memory_space<vmem>>, vector<4x1xf32>
    %41 = vector.broadcast %40 : vector<4x1xf32> to vector<4x40xf32>
    %42 = arith.addf %39, %41 : vector<4x40xf32>
    %c0_19 = arith.constant 0 : index
    %c0_20 = arith.constant 0 : index
    %43 = vector.load %arg8[%c0_19, %c0_20] : memref<4x40xf32, #tpu.memory_space<vmem>>, vector<4x40xf32>
    tpu.vector_store %arg8[%c0_19, %c0_20], %42 {strides = array<i32>} : memref<4x40xf32, #tpu.memory_space<vmem>>, vector<4x40xf32>,
    return
  }
  func.func @transform_0(%arg0: i32) -> (i32, i32) {
    %c0_i32 = arith.constant 0 : i32
    %c0_i32_0 = arith.constant 0 : i32
    return %c0_i32, %arg0 : i32, i32
  }
  func.func @transform_1(%arg0: i32) -> (i32, i32) {
    %c0_i32 = arith.constant 0 : i32
    %c0_i32_0 = arith.constant 0 : i32
    %c0_i32_1 = arith.constant 0 : i32
    return %c0_i32, %c0_i32_0 : i32, i32
  }
  func.func @transform_2(%arg0: i32) -> (i32, i32) {
    %c0_i32 = arith.constant 0 : i32
    %c0_i32_0 = arith.constant 0 : i32
    %c0_i32_1 = arith.constant 0 : i32
    return %c0_i32, %c0_i32_0 : i32, i32
  }
  func.func @transform_3(%arg0: i32) -> (i32, i32) {
    %c0_i32 = arith.constant 0 : i32
    %c0_i32_0 = arith.constant 0 : i32
    %c0_i32_1 = arith.constant 0 : i32
    return %c0_i32, %c0_i32_0 : i32, i32
  }
  func.func @transform_4(%arg0: i32) -> (i32, i32) {
    %c0_i32 = arith.constant 0 : i32
    %c0_i32_0 = arith.constant 0 : i32
    %c0_i32_1 = arith.constant 0 : i32
    return %c0_i32, %c0_i32_0 : i32, i32
  }
  func.func @transform_5(%arg0: i32) -> (i32, i32) {
    %c0_i32 = arith.constant 0 : i32
    %c0_i32_0 = arith.constant 0 : i32
    %c0_i32_1 = arith.constant 0 : i32
    return %c0_i32, %c0_i32_0 : i32, i32
  }
  func.func @transform_6(%arg0: i32) -> (i32, i32) {
    %c0_i32 = arith.constant 0 : i32
    %c0_i32_0 = arith.constant 0 : i32
    %c0_i32_1 = arith.constant 0 : i32
    return %c0_i32, %c0_i32_0 : i32, i32
  }
  func.func @transform_7(%arg0: i32) -> (i32, i32) {
    %c0_i32 = arith.constant 0 : i32
    %c0_i32_0 = arith.constant 0 : i32
    return %c0_i32, %arg0 : i32, i32
  }
}

</mosaic_0001>

<bundles_post_ra>
// kernel: mlp_forward.1
= control target key start
LH: loop header
LB: loop body
LE: loop exit
PB: predicated region body
PF: predicated region fallthrough
CT: control target
= control target key end

     0   :  { %v513_v2 = vmov 0   ;;  %s635_s0 = inlined_call_operand.vmem [shape: f32[4,40], index: 0, kind: input, shape index: {}]   ;;  %s636_s1 = inlined_call_operand.vmem [shape: f32[32,4], index: 1, kind: input, shape index: {}]   ;;  %s637_s2 = inlined_call_operand.vmem [shape: f32[32,1], index: 2, kind: input, shape index: {}]   ;;  %s638_s3 = inlined_call_operand.vmem [shape: f32[32,32], index: 3, kind: input, shape index: {}]   ;;  %s639_s4 = inlined_call_operand.vmem [shape: f32[32,1], index: 4, kind: input, shape index: {}]   ;;  %s640_s5 = inlined_call_operand.vmem [shape: f32[4,32], index: 5, kind: input, shape index: {}]   ;;  %s641_s6 = inlined_call_operand.vmem [shape: f32[4,1], index: 6, kind: input, shape index: {}]   ;;  %s642_s7 = inlined_call_operand.hbm [shape: f32[4,40], index: 7, kind: output, shape index: {}]  }
   0x1   :  { %v32_v0 = vld [vmem:[%s636_s1] sm:$0xff]  ;;  %476 = vset.pattern.permute.xlu1 %v513_v2  ;;  %475 = vset.pattern.permute.xlu0 %v513_v2  ;;  %v33_v3 = vld [vmem:[%s636_s1 + $0x8] sm:$0xff] }
   0x2   :  { %v28_v1 = vld [vmem:[%s637_s2] sm:$0xff]  ;;  %38 = vperm.xlu0 %475, %v32_v0   ;;  %v29_v4 = vld [vmem:[%s637_s2 + $0x8] sm:$0xff] }
   0x3   :  { %66 = vperm.xlu1 %476, %v28_v1  }
   0x4   :  { %12 = vsyncpa [#allocation3], 0  ;;  %v35_v5 = vld [vmem:[%s636_s1 + $0x18] sm:$0xff]  ;;  %v514_v6 = vmov 1   ;;  %v30_v7 = vld [vmem:[%s637_s2 + $0x10] sm:$0xff]  ;;  %v515_v9 = vmov 2   ;;  %v56_v24 = vlaneseq }
   0x5   :  { %v34_v8 = vld [vmem:[%s636_s1 + $0x10] sm:$0xff]  ;;  %v516_v10 = vmov 3   ;;  %v31_v11 = vld [vmem:[%s637_s2 + $0x18] sm:$0xff]  ;;  %v180_v12 = vld [vmem:[%s638_s3] sm:$0xff]  ;;  %vm208_vm0 = vcmask 261120   ;;  %vm518_vm1 = vmmov 0  }
   0x6   :  { %43 = vperm.xlu0 %475, %v33_v3   ;;  %436 = vmatprep.mubr.msk.f32.mxu0 %vm208_vm0, %v180_v12  ;;  %v185_v13 = vld [vmem:[%s639_s4 + $0x8] sm:$0xff]  ;;  %v184_v14 = vld [vmem:[%s639_s4] sm:$0xff]  ;;  %v186_v15 = vld [vmem:[%s639_s4 + $0x10] sm:$0xff]  ;;  %v57_v27 = vshrl.u32 %v56_v24, 7  ;;  %s520_s10 = smov [#allocation2]   ;;  %vm394_vm2 = vcmask 322560  }
   0x7   :  { %71 = vperm.xlu1 %476, %v29_v4   ;;  %v187_v16 = vld [vmem:[%s639_s4 + $0x18] sm:$0xff]  ;;  %v315_v17 = vld [vmem:[%s641_s6] sm:$0xf]  ;;  %s402_s11 = sshll.u32 %s520_s10, 4  ;;  %s403_s11 = int_to_ptr.vmem [resolvable:$true] %s402_s11 }
   0x8   :  { %v58_v29 = vsub.s32 0, %v57_v27  ;;  %v106_v30 = vsub.s32 1, %v57_v27  ;;  %v27_v32 = vld [vmem:[%s635_s0] sm:$0xf]  ;;  %v134_v35 = vsub.s32 2, %v57_v27  ;;  %v162_v39 = vsub.s32 3, %v57_v27  ;;  %p494_p1 = scmp.lt.s32.totalorder %s403_s11, %s403_s11 }
   0x9   :  { %v181_v27 = vld [vmem:[%s638_s3 + $0x8] sm:$0xff]  ;;  %s489_s12 = scalar_lea.vmem %s403_s11, 64 }
   0xa   :  { %53 = vperm.xlu0 %475, %v35_v5   ;;  %v59_v33 = vrot.slane %v27_v32, %v58_v29  ;;  %v107_v34 = vrot.slane %v27_v32, %v106_v30  ;;  %v135_v41 = vrot.slane %v27_v32, %v134_v35  ;;  %v163_v46 = vrot.slane %v27_v32, %v162_v39  ;;  %v183_v29 = vld [vmem:[%s638_s3 + $0x18] sm:$0xff]  ;;  %p490_p0 = scmp.ne.s32.totalorder %s403_s11, %s489_s12  ;;  %p495_p2 = scmp.lt.s32.totalorder %s489_s12, %s489_s12 }
   0xb   :  { %477 = vset.pattern.permute.xlu1 %v514_v6  ;;  %v517_v30 = vmov 0.0|0.0  }
   0xc   :  { %93 = vperm.xlu1 %477, %v33_v3   ;;  %461 = vmatprep.subr.bf16.mxu1 %v517_v30  ;;  %p496_p3 = por %p495_p2, %p494_p1 }
   0xe   :  { %76 = vperm.xlu0 %475, %v30_v7   ;;  %p497_p4 = pnand %p496_p3, %p490_p0 }
  0x10   :  { %478 = vset.pattern.permute.xlu1 %v513_v2 }
  0x11   :  { %48 = vperm.xlu1 %478, %v34_v8  }
  0x12   :  { %480 = vset.pattern.permute.xlu0 %v514_v6 }
  0x13   :  { %89 = vperm.xlu0 %480, %v32_v0  }
  0x15   :  { %479 = vset.pattern.permute.xlu1 %v515_v9 }
  0x16   :  { %117 = vperm.xlu1 %479, %v32_v0  }
  0x17   :  { %97 = vperm.xlu0 %480, %v34_v8  }
  0x1a   :  { %121 = vperm.xlu1 %479, %v33_v3  }
  0x1b   :  { %484 = vset.pattern.permute.xlu0 %v516_v10 }
  0x1c   :  { %149 = vperm.xlu0 %484, %v33_v3  }
  0x1e   :  { %481 = vset.pattern.permute.xlu1 %v513_v2 }
  0x1f   :  { %81 = vperm.xlu1 %481, %v31_v11  }
  0x20   :  { %153 = vperm.xlu0 %484, %v34_v8  }
  0x23   :  { %482 = vset.pattern.permute.xlu1 %v514_v6 }
  0x24   :  { %101 = vperm.xlu1 %482, %v35_v5   ;;  %487 = vset.pattern.permute.xlu0 %v513_v2 }
  0x25   :  { %190 = vperm.xlu0 %487, %v184_v14  }
  0x28   :  { %483 = vset.pattern.permute.xlu1 %v516_v10 }
  0x29   :  { %145 = vperm.xlu1 %483, %v32_v0   ;;  %205 = vperm.xlu0 %487, %v187_v16  }
  0x2d   :  { %485 = vset.pattern.permute.xlu1 %v515_v9 }
  0x2e   :  { %125 = vperm.xlu1 %485, %v34_v8  }
  0x32   :  { %129 = vperm.xlu1 %485, %v35_v5  }
  0x36   :  { %486 = vset.pattern.permute.xlu1 %v516_v10 }
  0x37   :  { %157 = vperm.xlu1 %486, %v35_v5  }
  0x3b   :  { %488 = vset.pattern.permute.xlu1 %v513_v2 }
  0x3c   :  { %195 = vperm.xlu1 %488, %v185_v13  }
  0x40   :  { %200 = vperm.xlu1 %488, %v186_v15  }
  0x44   :  { %318 = vperm.xlu1 %488, %v315_v17  }
  0x81   :  { %v39_v18 = vpop.permute.xlu0 %38 }
  0x82   :  { %v67_v19 = vpop.permute.xlu1 %66  ;;  %v60_v43 = vmul.f32 %v59_v33, %v39_v18 }
  0x84   :  { %v84_v50 = vadd.f32 %v67_v19, %v60_v43 }
  0x85   :  { %v44_v20 = vpop.permute.xlu0 %43 }
  0x86   :  { %v72_v21 = vpop.permute.xlu1 %71  ;;  %v61_v38 = vmul.f32 %v59_v33, %v44_v20 }
  0x88   :  { %v85_v44 = vadd.f32 %v72_v21, %v61_v38 }
  0x89   :  { %v54_v22 = vpop.permute.xlu0 %53 }
  0x8a   :  { %v63_v8 = vmul.f32 %v59_v33, %v54_v22 }
  0x8b   :  { %v94_v23 = vpop.permute.xlu1 %93 }
  0x8c   :  { %v109_v40 = vmul.f32 %v107_v34, %v94_v23 }
  0x8d   :  { %v77_v25 = vpop.permute.xlu0 %76 }
  0x8e   :  { %v113_v48 = vadd.f32 %v109_v40, %v85_v44 }
  0x90   :  { %v49_v26 = vpop.permute.xlu1 %48 }
  0x91   :  { %v62_v58 = vmul.f32 %v59_v33, %v49_v26 }
  0x92   :  { %v90_v28 = vpop.permute.xlu0 %89 }
  0x93   :  { %v108_v49 = vmul.f32 %v107_v34, %v90_v28  ;;  %v86_v0 = vadd.f32 %v77_v25, %v62_v58  ;;  %v182_v28 = vld [vmem:[%s638_s3 + $0x10] sm:$0xff] }
  0x95   :  { %v118_v31 = vpop.permute.xlu1 %117  ;;  %v112_v54 = vadd.f32 %v108_v49, %v84_v50 }
  0x96   :  { %v98_v37 = vpop.permute.xlu0 %97  ;;  %v136_v55 = vmul.f32 %v135_v41, %v118_v31  ;;  %v519_v31 = vmov 0.0  }
  0x97   :  { %v110_v61 = vmul.f32 %v107_v34, %v98_v37  ;;  %450 = vmatprep.mubr.msk.f32.mxu1 %vm518_vm1, %v519_v31 }
  0x98   :  { %v140_v59 = vadd.f32 %v136_v55, %v112_v54  ;;  %v314_v54 = vld [vmem:[%s640_s5] sm:$0xf] }
  0x99   :  { %v122_v36 = vpop.permute.xlu1 %121  ;;  %v114_v5 = vadd.f32 %v110_v61, %v86_v0 }
  0x9a   :  { %v137_v45 = vmul.f32 %v135_v41, %v122_v36 }
  0x9b   :  { %v150_v47 = vpop.permute.xlu0 %149 }
  0x9c   :  { %v141_v51 = vadd.f32 %v137_v45, %v113_v48  ;;  %v165_v52 = vmul.f32 %v163_v46, %v150_v47 }
  0x9e   :  { %v82_v42 = vpop.permute.xlu1 %81  ;;  %v169_v56 = vadd.f32 %v165_v52, %v141_v51 }
  0x9f   :  { %v154_v4 = vpop.permute.xlu0 %153  ;;  %v87_v14 = vadd.f32 %v82_v42, %v63_v8 }
  0xa0   :  { %v173_v62 = vmul.f32 0.1, %v169_v56  ;;  %v166_v11 = vmul.f32 %v163_v46, %v154_v4 }
  0xa2   :  { %v177_v7 = vmax.f32 %v169_v56, %v173_v62 }
  0xa3   :  { %v102_v53 = vpop.permute.xlu1 %101 }
  0xa4   :  { %v111_v9 = vmul.f32 %v107_v34, %v102_v53  ;;  %v191_v32 = vpop.permute.xlu0 %190 }
  0xa6   :  { %v115_v16 = vadd.f32 %v111_v9, %v87_v14 }
  0xa8   :  { %v146_v57 = vpop.permute.xlu1 %145  ;;  %v206_v39 = vpop.permute.xlu0 %205 }
  0xa9   :  { %v164_v60 = vmul.f32 %v163_v46, %v146_v57 }
  0xab   :  { %v168_v63 = vadd.f32 %v164_v60, %v140_v59 }
  0xad   :  { %v172_v1 = vmul.f32 0.1, %v168_v63  ;;  %v126_v2 = vpop.permute.xlu1 %125 }
  0xae   :  { %v138_v3 = vmul.f32 %v135_v41, %v126_v2 }
  0xaf   :  { %v176_v6 = vmax.f32 %v168_v63, %v172_v1 }
  0xb0   :  { %v142_v10 = vadd.f32 %v138_v3, %v114_v5 }
  0xb1   :  { %v130_v12 = vpop.permute.xlu1 %129  ;;  %v453_v13 = vpack.c.bf16 %v177_v7, %v176_v6 }
  0xb2   :  { %v139_v15 = vmul.f32 %v135_v41, %v130_v12  ;;  %v170_v17 = vadd.f32 %v166_v11, %v142_v10 }
  0xb3   :  { %454 = vmatprep.subr.bf16.mxu0 %v453_v13 }
  0xb4   :  { %456 = vmatpush3.bf16.msra.mxu0 %v453_v13  ;;  %v143_v19 = vadd.f32 %v139_v15, %v115_v16  ;;  %v174_v21 = vmul.f32 0.1, %v170_v17 }
  0xb6   :  { %v158_v18 = vpop.permute.xlu1 %157  ;;  %v178_v25 = vmax.f32 %v170_v17, %v174_v21 }
  0xb7   :  { %v167_v20 = vmul.f32 %v163_v46, %v158_v18 }
  0xb9   :  { %v171_v23 = vadd.f32 %v167_v20, %v143_v19 }
  0xbb   :  { %v175_v24 = vmul.f32 0.1, %v171_v23  ;;  %v196_v33 = vpop.permute.xlu1 %195 }
  0xbd   :  { %v179_v26 = vmax.f32 %v171_v23, %v175_v24 }
  0xbf   :  { %v457_v22 = vpack.c.bf16 %v179_v26, %v178_v25  ;;  %v201_v42 = vpop.permute.xlu1 %200 }
  0xc1   :  { %458 = vmatprep.subr.bf16.mxu0 %v457_v22 }
  0xc2   :  { %460 = vmatpush3.bf16.msra.mxu0 %v457_v22 }
  0xc3   :  { %v319_v55 = vpop.permute.xlu1 %318 }
  0xc5   :  { %437 = vmatmul.mubr.msk.f32.vlgmr.msra.gmra.mrb[0].mxu0 %vm208_vm0, %v181_v27 }
  0xc6   :  { %439 = vmatprep.mubr.msk.f32.mxu0 %vm208_vm0, %v182_v28 }
  0xc9   :  { %440 = vmatmul.mubr.msk.f32.gmra.mrb[2].mxu0 %vm208_vm0, %v183_v29 }
 0x198   :  { %v438_v34 = vpop.f32.mrb[0].mxu0 }
 0x199   :  { %v293_v35 = vadd.f32 %v438_v34, %v196_v33  ;;  %v287_v36 = vpop.f32.mrb[1].mxu0 }
 0x19a   :  { %v288_v37 = vadd.f32 %v287_v36, %v191_v32 }
 0x19b   :  { %v307_v38 = vmul.f32 0.1, %v293_v35 }
 0x19c   :  { %v306_v40 = vmul.f32 0.1, %v288_v37  ;;  %v441_v41 = vpop.f32.mrb[2].mxu0 }
 0x19d   :  { %v311_v43 = vmax.f32 %v293_v35, %v307_v38  ;;  %v303_v44 = vadd.f32 %v441_v41, %v206_v39  ;;  %v297_v45 = vpop.f32.mrb[3].mxu0 }
 0x19e   :  { %v310_v46 = vmax.f32 %v288_v37, %v306_v40  ;;  %v298_v47 = vadd.f32 %v297_v45, %v201_v42 }
 0x19f   :  { %v309_v48 = vmul.f32 0.1, %v303_v44 }
 0x1a0   :  { %v308_v49 = vmul.f32 0.1, %v298_v47  ;;  %v462_v50 = vpack.c.bf16 %v311_v43, %v310_v46 }
 0x1a1   :  { %v313_v51 = vmax.f32 %v303_v44, %v309_v48 }
 0x1a2   :  { %v312_v52 = vmax.f32 %v298_v47, %v308_v49  ;;  %463 = vmatpush3.bf16.msra.mxu1 %v462_v50 }
 0x1a3   :  { %464 = vmatprep.subr.bf16.mxu1 %v517_v30 }
 0x1a4   :  { %v465_v53 = vpack.c.bf16 %v313_v51, %v312_v52 }
 0x1a6   :  { %466 = vmatpush3.bf16.msra.mxu1 %v465_v53 }
 0x1a9   :  { %451 = vmatmul.mubr.msk.f32.vlgmr.msra.gmra.mrb[0].mxu1 %vm208_vm0, %v314_v54 }
 0x27c   :  { %v390_v56 = vpop.f32.mrb[0].mxu1 }
 0x27d   :  { %v391_v57 = vadd.f32 %v390_v56, %v319_v55  ;;  %v452_v58 = vpop.f32.mrb[1].mxu1 }
 0x27f   :  { %395 = vst.msk [vmem:[#allocation2] sm:$0xf] %vm394_vm2, %v391_v57 }
 0x280   :  { %500 = shalt.err (!%p497_p4)
}
 0x281   :  { %s501_s14 = scalar_lea.hbm %s642_s7, 64 }
 0x282   :  { %p502_p5 = scmp.ne.s32.totalorder %s642_s7, %s501_s14  ;;  %p505_p6 = scmp.lt.u32.totalorder %s501_s14, %s642_s7 }
 0x284   :  { %p507_p7 = pnand %p505_p6, %p502_p5 }
 0x286   :  { %510 = shalt.err (!%p507_p7)
}
 0x287   :  { %405 = dma.vmem_to_hbm [thread:$0]  %s403_s11, 64, %s642_s7, [#allocation3]  }
 0x288   :  { %511 = dma.done.wait [#allocation3], 64  }
 0x289   :  { %512 = vsyncadd [#allocation3], 4294967232 }
 0x28a   :  { %409 = vsyncpa [#allocation3], 1 }

</bundles_post_ra>
